<compile_context>
chip_gen: v6e
topology: v6e:2x2x1
jax: 0.10.0
libtpu: 0.0.40
codegen_flags: <defaults>
</compile_context>

<pallas_src>
import functools

import jax
import jax.numpy as jnp
from jax.experimental import pallas as pl
from jax.experimental.pallas import tpu as pltpu

SIZES = [1, 2, 4, 8, 8, 4, 2, 1]
N_LAYERS = len(SIZES) - 1


def _round_up(x, m):
    return ((x + m - 1) // m) * m


def _newstnet_kernel(x_ref, *refs):
    # refs = (w0, b0, w1, b1, ..., w6, b6, out_ref)
    out_ref = refs[-1]
    param_refs = refs[:-1]

    # Activations are kept in f32 between layers (bias add / ReLU on the VPU in
    # f32); only the MXU operands are bf16.
    h = x_ref[...].astype(jnp.float32)
    for i in range(N_LAYERS):
        w = param_refs[2 * i][...]          # bf16, fed straight to the MXU
        b = param_refs[2 * i + 1][...]      # f32 (1, out_f)
        h = jnp.dot(h.astype(w.dtype), w,
                    preferred_element_type=jnp.float32) + b
        if i % 2 == 1:
            h = jnp.maximum(h, 0.0)         # ReLU
        # else: Dropout() -> identity (eval semantics)
    out_ref[...] = h.astype(out_ref.dtype)


def init_params(key, input_size):
    """Deterministic PyTorch-style (Kaiming-uniform-ish) Linear init.

    Weights in bf16 (MXU fast path), biases in f32.
    """
    params = []
    for i in range(N_LAYERS):
        in_f = input_size * SIZES[i]
        out_f = input_size * SIZES[i + 1]
        key, kw, kb = jax.random.split(key, 3)
        bound = 1.0 / jnp.sqrt(jnp.asarray(in_f, jnp.float32))
        w = jax.random.uniform(kw, (in_f, out_f), jnp.float32, -bound, bound)
        b = jax.random.uniform(kb, (1, out_f), jnp.float32, -bound, bound)
        params.append((w.astype(jnp.bfloat16), b))
    return params


@functools.partial(jax.jit, static_argnames=("tile_b",))
def newstnet_forward(x, params, *, tile_b=512):
    B, input_size = x.shape
    out_features = input_size * SIZES[-1]

    # Clamp the tile to the (sublane-aligned) batch for small inputs; pad the
    # batch up to a tile multiple so every grid step sees a full tile.
    tile_b = min(tile_b, _round_up(B, 8))
    b_pad = _round_up(B, tile_b)
    if b_pad != B:
        x = jnp.pad(x, ((0, b_pad - B), (0, 0)))
    num_tiles = b_pad // tile_b

    flat_params = []
    for w, b in params:
        flat_params.extend([w, b])

    # x/out are tiled over the batch; weights/biases have a constant block
    # index so they are fetched once and stay resident in VMEM.
    in_specs = [pl.BlockSpec((tile_b, input_size), lambda i: (i, 0))]
    for p in flat_params:
        in_specs.append(pl.BlockSpec(p.shape, lambda i: (0, 0)))
    out_spec = pl.BlockSpec((tile_b, out_features), lambda i: (i, 0))

    layer_dims = [(input_size * SIZES[i], input_size * SIZES[i + 1])
                  for i in range(N_LAYERS)]
    flops = 2 * b_pad * sum(fi * fo for fi, fo in layer_dims)
    bytes_accessed = (
        x.size * x.dtype.itemsize
        + b_pad * out_features * x.dtype.itemsize
        + sum(p.size * p.dtype.itemsize for p in flat_params)
    )

    out = pl.pallas_call(
        _newstnet_kernel,
        out_shape=jax.ShapeDtypeStruct((b_pad, out_features), x.dtype),
        grid=(num_tiles,),
        in_specs=in_specs,
        out_specs=out_spec,
        compiler_params=pltpu.CompilerParams(
            dimension_semantics=("parallel",)),
        cost_estimate=pl.CostEstimate(
            flops=flops, transcendentals=0, bytes_accessed=bytes_accessed),
    )(x, *flat_params)

    return out[:B]


def _reference_forward(x, params):
    """Pure-JAX reference with the same numerics (bf16 MXU operands, f32 acc)."""
    h = x.astype(jnp.float32)
    for i, (w, b) in enumerate(params):
        h = jnp.dot(h.astype(w.dtype), w,
                    preferred_element_type=jnp.float32) + b
        if i % 2 == 1:
            h = jnp.maximum(h, 0.0)
    return h.astype(x.dtype)


if __name__ == "__main__":
    key = jax.random.PRNGKey(0)
    B, input_size = 8, 32          # input_shape[-1] = 32

    key, kx = jax.random.split(key)
    x = jax.random.normal(kx, (B, input_size), jnp.float32)

    params = init_params(key, input_size)

    out = newstnet_forward(x, params)
    out = jax.block_until_ready(out)

    # sanity: output has same trailing dim as input (sizes end at multiplier 1)
    assert out.shape == (B, input_size), out.shape
    assert bool(jnp.all(jnp.isfinite(out)))

    ref = _reference_forward(x, params)
    assert bool(jnp.allclose(out, ref, rtol=2e-2, atol=2e-2)), \
        float(jnp.max(jnp.abs(out - ref)))

    print("KERNEL_OK")
</pallas_src>

<mosaic_0001>
module attributes {stable_mosaic.version = 11 : i64} {
  func.func @_newstnet_kernel(%arg0: i32, %arg1: memref<8x32xf32, #tpu.memory_space<vmem>>, %arg2: memref<32x64xbf16, #tpu.memory_space<vmem>>, %arg3: memref<1x64xf32, #tpu.memory_space<vmem>>, %arg4: memref<64x128xbf16, #tpu.memory_space<vmem>>, %arg5: memref<1x128xf32, #tpu.memory_space<vmem>>, %arg6: memref<128x256xbf16, #tpu.memory_space<vmem>>, %arg7: memref<1x256xf32, #tpu.memory_space<vmem>>, %arg8: memref<256x256xbf16, #tpu.memory_space<vmem>>, %arg9: memref<1x256xf32, #tpu.memory_space<vmem>>, %arg10: memref<256x128xbf16, #tpu.memory_space<vmem>>, %arg11: memref<1x128xf32, #tpu.memory_space<vmem>>, %arg12: memref<128x64xbf16, #tpu.memory_space<vmem>>, %arg13: memref<1x64xf32, #tpu.memory_space<vmem>>, %arg14: memref<64x32xbf16, #tpu.memory_space<vmem>>, %arg15: memref<1x32xf32, #tpu.memory_space<vmem>>, %arg16: memref<8x32xf32, #tpu.memory_space<vmem>>) attributes {dimension_semantics = [#tpu.dimension_semantics<parallel>], iteration_bounds = array<i64: 1>, scalar_prefetch = 0 : i64, scratch_operands = 0 : i64, tpu.core_type = #tpu.core_type<tc>, window_params = [{transform_indices = @transform_0, window_bounds = array<i64: 8, 32>}, {pipeline_mode = #tpu.pipeline_mode<synchronous>, transform_indices = @transform_1, window_bounds = array<i64: 32, 64>}, {pipeline_mode = #tpu.pipeline_mode<synchronous>, transform_indices = @transform_2, window_bounds = array<i64: 1, 64>}, {pipeline_mode = #tpu.pipeline_mode<synchronous>, transform_indices = @transform_3, window_bounds = array<i64: 64, 128>}, {pipeline_mode = #tpu.pipeline_mode<synchronous>, transform_indices = @transform_4, window_bounds = array<i64: 1, 128>}, {pipeline_mode = #tpu.pipeline_mode<synchronous>, transform_indices = @transform_5, window_bounds = array<i64: 128, 256>}, {pipeline_mode = #tpu.pipeline_mode<synchronous>, transform_indices = @transform_6, window_bounds = array<i64: 1, 256>}, {pipeline_mode = #tpu.pipeline_mode<synchronous>, transform_indices = @transform_7, window_bounds = array<i64: 256, 256>}, {pipeline_mode = #tpu.pipeline_mode<synchronous>, transform_indices = @transform_8, window_bounds = array<i64: 1, 256>}, {pipeline_mode = #tpu.pipeline_mode<synchronous>, transform_indices = @transform_9, window_bounds = array<i64: 256, 128>}, {pipeline_mode = #tpu.pipeline_mode<synchronous>, transform_indices = @transform_10, window_bounds = array<i64: 1, 128>}, {pipeline_mode = #tpu.pipeline_mode<synchronous>, transform_indices = @transform_11, window_bounds = array<i64: 128, 64>}, {pipeline_mode = #tpu.pipeline_mode<synchronous>, transform_indices = @transform_12, window_bounds = array<i64: 1, 64>}, {pipeline_mode = #tpu.pipeline_mode<synchronous>, transform_indices = @transform_13, window_bounds = array<i64: 64, 32>}, {pipeline_mode = #tpu.pipeline_mode<synchronous>, transform_indices = @transform_14, window_bounds = array<i64: 1, 32>}, {transform_indices = @transform_15, window_bounds = array<i64: 8, 32>}]} {
    %c0 = arith.constant 0 : index
    %c0_0 = arith.constant 0 : index
    %0 = vector.load %arg1[%c0, %c0_0] : memref<8x32xf32, #tpu.memory_space<vmem>>, vector<8x32xf32>
    %c0_1 = arith.constant 0 : index
    %c0_2 = arith.constant 0 : index
    %1 = vector.load %arg2[%c0_1, %c0_2] : memref<32x64xbf16, #tpu.memory_space<vmem>>, vector<32x64xbf16>
    %c0_3 = arith.constant 0 : index
    %c0_4 = arith.constant 0 : index
    %2 = vector.load %arg3[%c0_3, %c0_4] : memref<1x64xf32, #tpu.memory_space<vmem>>, vector<1x64xf32>
    %3 = arith.truncf %0 : vector<8x32xf32> to vector<8x32xbf16>
    %cst = arith.constant dense<0.000000e+00> : vector<8x64xf32>
    %4 = tpu.matmul %3, %1, %cst {dimension_numbers = #tpu.dot_dimension_numbers<[1], [0], [0], [1], [0, 0, 1, 1], [], []>} : vector<8x32xbf16>, vector<32x64xbf16>, vector<8x64xf32> -> vector<8x64xf32>
    %5 = vector.broadcast %2 : vector<1x64xf32> to vector<8x64xf32>
    %6 = arith.addf %4, %5 : vector<8x64xf32>
    %c0_5 = arith.constant 0 : index
    %c0_6 = arith.constant 0 : index
    %7 = vector.load %arg4[%c0_5, %c0_6] : memref<64x128xbf16, #tpu.memory_space<vmem>>, vector<64x128xbf16>
    %c0_7 = arith.constant 0 : index
    %c0_8 = arith.constant 0 : index
    %8 = vector.load %arg5[%c0_7, %c0_8] : memref<1x128xf32, #tpu.memory_space<vmem>>, vector<1x128xf32>
    %9 = arith.truncf %6 : vector<8x64xf32> to vector<8x64xbf16>
    %cst_9 = arith.constant dense<0.000000e+00> : vector<8x128xf32>
    %10 = tpu.matmul %9, %7, %cst_9 {dimension_numbers = #tpu.dot_dimension_numbers<[1], [0], [0], [1], [0, 0, 1, 1], [], []>} : vector<8x64xbf16>, vector<64x128xbf16>, vector<8x128xf32> -> vector<8x128xf32>
    %11 = vector.broadcast %8 : vector<1x128xf32> to vector<8x128xf32>
    %12 = arith.addf %10, %11 : vector<8x128xf32>
    %cst_10 = arith.constant 0.000000e+00 : f32
    %13 = vector.broadcast %cst_10 : f32 to vector<8x128xf32>
    %14 = arith.maximumf %12, %13 : vector<8x128xf32>
    %c0_11 = arith.constant 0 : index
    %c0_12 = arith.constant 0 : index
    %15 = vector.load %arg6[%c0_11, %c0_12] : memref<128x256xbf16, #tpu.memory_space<vmem>>, vector<128x256xbf16>
    %c0_13 = arith.constant 0 : index
    %c0_14 = arith.constant 0 : index
    %16 = vector.load %arg7[%c0_13, %c0_14] : memref<1x256xf32, #tpu.memory_space<vmem>>, vector<1x256xf32>
    %17 = arith.truncf %14 : vector<8x128xf32> to vector<8x128xbf16>
    %cst_15 = arith.constant dense<0.000000e+00> : vector<8x256xf32>
    %18 = tpu.matmul %17, %15, %cst_15 {dimension_numbers = #tpu.dot_dimension_numbers<[1], [0], [0], [1], [0, 0, 1, 1], [], []>} : vector<8x128xbf16>, vector<128x256xbf16>, vector<8x256xf32> -> vector<8x256xf32>
    %19 = vector.broadcast %16 : vector<1x256xf32> to vector<8x256xf32>
    %20 = arith.addf %18, %19 : vector<8x256xf32>
    %c0_16 = arith.constant 0 : index
    %c0_17 = arith.constant 0 : index
    %21 = vector.load %arg8[%c0_16, %c0_17] : memref<256x256xbf16, #tpu.memory_space<vmem>>, vector<256x256xbf16>
    %c0_18 = arith.constant 0 : index
    %c0_19 = arith.constant 0 : index
    %22 = vector.load %arg9[%c0_18, %c0_19] : memref<1x256xf32, #tpu.memory_space<vmem>>, vector<1x256xf32>
    %23 = arith.truncf %20 : vector<8x256xf32> to vector<8x256xbf16>
    %cst_20 = arith.constant dense<0.000000e+00> : vector<8x256xf32>
    %24 = tpu.matmul %23, %21, %cst_20 {dimension_numbers = #tpu.dot_dimension_numbers<[1], [0], [0], [1], [0, 0, 1, 1], [], []>} : vector<8x256xbf16>, vector<256x256xbf16>, vector<8x256xf32> -> vector<8x256xf32>
    %25 = vector.broadcast %22 : vector<1x256xf32> to vector<8x256xf32>
    %26 = arith.addf %24, %25 : vector<8x256xf32>
    %cst_21 = arith.constant 0.000000e+00 : f32
    %27 = vector.broadcast %cst_21 : f32 to vector<8x256xf32>
    %28 = arith.maximumf %26, %27 : vector<8x256xf32>
    %c0_22 = arith.constant 0 : index
    %c0_23 = arith.constant 0 : index
    %29 = vector.load %arg10[%c0_22, %c0_23] : memref<256x128xbf16, #tpu.memory_space<vmem>>, vector<256x128xbf16>
    %c0_24 = arith.constant 0 : index
    %c0_25 = arith.constant 0 : index
    %30 = vector.load %arg11[%c0_24, %c0_25] : memref<1x128xf32, #tpu.memory_space<vmem>>, vector<1x128xf32>
    %31 = arith.truncf %28 : vector<8x256xf32> to vector<8x256xbf16>
    %cst_26 = arith.constant dense<0.000000e+00> : vector<8x128xf32>
    %32 = tpu.matmul %31, %29, %cst_26 {dimension_numbers = #tpu.dot_dimension_numbers<[1], [0], [0], [1], [0, 0, 1, 1], [], []>} : vector<8x256xbf16>, vector<256x128xbf16>, vector<8x128xf32> -> vector<8x128xf32>
    %33 = vector.broadcast %30 : vector<1x128xf32> to vector<8x128xf32>
    %34 = arith.addf %32, %33 : vector<8x128xf32>
    %c0_27 = arith.constant 0 : index
    %c0_28 = arith.constant 0 : index
    %35 = vector.load %arg12[%c0_27, %c0_28] : memref<128x64xbf16, #tpu.memory_space<vmem>>, vector<128x64xbf16>
    %c0_29 = arith.constant 0 : index
    %c0_30 = arith.constant 0 : index
    %36 = vector.load %arg13[%c0_29, %c0_30] : memref<1x64xf32, #tpu.memory_space<vmem>>, vector<1x64xf32>
    %37 = arith.truncf %34 : vector<8x128xf32> to vector<8x128xbf16>
    %cst_31 = arith.constant dense<0.000000e+00> : vector<8x64xf32>
    %38 = tpu.matmul %37, %35, %cst_31 {dimension_numbers = #tpu.dot_dimension_numbers<[1], [0], [0], [1], [0, 0, 1, 1], [], []>} : vector<8x128xbf16>, vector<128x64xbf16>, vector<8x64xf32> -> vector<8x64xf32>
    %39 = vector.broadcast %36 : vector<1x64xf32> to vector<8x64xf32>
    %40 = arith.addf %38, %39 : vector<8x64xf32>
    %cst_32 = arith.constant 0.000000e+00 : f32
    %41 = vector.broadcast %cst_32 : f32 to vector<8x64xf32>
    %42 = arith.maximumf %40, %41 : vector<8x64xf32>
    %c0_33 = arith.constant 0 : index
    %c0_34 = arith.constant 0 : index
    %43 = vector.load %arg14[%c0_33, %c0_34] : memref<64x32xbf16, #tpu.memory_space<vmem>>, vector<64x32xbf16>
    %c0_35 = arith.constant 0 : index
    %c0_36 = arith.constant 0 : index
    %44 = vector.load %arg15[%c0_35, %c0_36] : memref<1x32xf32, #tpu.memory_space<vmem>>, vector<1x32xf32>
    %45 = arith.truncf %42 : vector<8x64xf32> to vector<8x64xbf16>
    %cst_37 = arith.constant dense<0.000000e+00> : vector<8x32xf32>
    %46 = tpu.matmul %45, %43, %cst_37 {dimension_numbers = #tpu.dot_dimension_numbers<[1], [0], [0], [1], [0, 0, 1, 1], [], []>} : vector<8x64xbf16>, vector<64x32xbf16>, vector<8x32xf32> -> vector<8x32xf32>
    %47 = vector.broadcast %44 : vector<1x32xf32> to vector<8x32xf32>
    %48 = arith.addf %46, %47 : vector<8x32xf32>
    %c0_38 = arith.constant 0 : index
    %c0_39 = arith.constant 0 : index
    %49 = vector.load %arg16[%c0_38, %c0_39] : memref<8x32xf32, #tpu.memory_space<vmem>>, vector<8x32xf32>
    tpu.vector_store %arg16[%c0_38, %c0_39], %48 {strides = array<i32>} : memref<8x32xf32, #tpu.memory_space<vmem>>, vector<8x32xf32>,
    return
  }
  func.func @transform_0(%arg0: i32) -> (i32, i32) {
    %c0_i32 = arith.constant 0 : i32
    %c0_i32_0 = arith.constant 0 : i32
    return %arg0, %c0_i32 : i32, i32
  }
  func.func @transform_1(%arg0: i32) -> (i32, i32) {
    %c0_i32 = arith.constant 0 : i32
    %c0_i32_0 = arith.constant 0 : i32
    %c0_i32_1 = arith.constant 0 : i32
    return %c0_i32, %c0_i32_0 : i32, i32
  }
  func.func @transform_2(%arg0: i32) -> (i32, i32) {
    %c0_i32 = arith.constant 0 : i32
    %c0_i32_0 = arith.constant 0 : i32
    %c0_i32_1 = arith.constant 0 : i32
    return %c0_i32, %c0_i32_0 : i32, i32
  }
  func.func @transform_3(%arg0: i32) -> (i32, i32) {
    %c0_i32 = arith.constant 0 : i32
    %c0_i32_0 = arith.constant 0 : i32
    %c0_i32_1 = arith.constant 0 : i32
    return %c0_i32, %c0_i32_0 : i32, i32
  }
  func.func @transform_4(%arg0: i32) -> (i32, i32) {
    %c0_i32 = arith.constant 0 : i32
    %c0_i32_0 = arith.constant 0 : i32
    %c0_i32_1 = arith.constant 0 : i32
    return %c0_i32, %c0_i32_0 : i32, i32
  }
  func.func @transform_5(%arg0: i32) -> (i32, i32) {
    %c0_i32 = arith.constant 0 : i32
    %c0_i32_0 = arith.constant 0 : i32
    %c0_i32_1 = arith.constant 0 : i32
    return %c0_i32, %c0_i32_0 : i32, i32
  }
  func.func @transform_6(%arg0: i32) -> (i32, i32) {
    %c0_i32 = arith.constant 0 : i32
    %c0_i32_0 = arith.constant 0 : i32
    %c0_i32_1 = arith.constant 0 : i32
    return %c0_i32, %c0_i32_0 : i32, i32
  }
  func.func @transform_7(%arg0: i32) -> (i32, i32) {
    %c0_i32 = arith.constant 0 : i32
    %c0_i32_0 = arith.constant 0 : i32
    %c0_i32_1 = arith.constant 0 : i32
    return %c0_i32, %c0_i32_0 : i32, i32
  }
  func.func @transform_8(%arg0: i32) -> (i32, i32) {
    %c0_i32 = arith.constant 0 : i32
    %c0_i32_0 = arith.constant 0 : i32
    %c0_i32_1 = arith.constant 0 : i32
    return %c0_i32, %c0_i32_0 : i32, i32
  }
  func.func @transform_9(%arg0: i32) -> (i32, i32) {
    %c0_i32 = arith.constant 0 : i32
    %c0_i32_0 = arith.constant 0 : i32
    %c0_i32_1 = arith.constant 0 : i32
    return %c0_i32, %c0_i32_0 : i32, i32
  }
  func.func @transform_10(%arg0: i32) -> (i32, i32) {
    %c0_i32 = arith.constant 0 : i32
    %c0_i32_0 = arith.constant 0 : i32
    %c0_i32_1 = arith.constant 0 : i32
    return %c0_i32, %c0_i32_0 : i32, i32
  }
  func.func @transform_11(%arg0: i32) -> (i32, i32) {
    %c0_i32 = arith.constant 0 : i32
    %c0_i32_0 = arith.constant 0 : i32
    %c0_i32_1 = arith.constant 0 : i32
    return %c0_i32, %c0_i32_0 : i32, i32
  }
  func.func @transform_12(%arg0: i32) -> (i32, i32) {
    %c0_i32 = arith.constant 0 : i32
    %c0_i32_0 = arith.constant 0 : i32
    %c0_i32_1 = arith.constant 0 : i32
    return %c0_i32, %c0_i32_0 : i32, i32
  }
  func.func @transform_13(%arg0: i32) -> (i32, i32) {
    %c0_i32 = arith.constant 0 : i32
    %c0_i32_0 = arith.constant 0 : i32
    %c0_i32_1 = arith.constant 0 : i32
    return %c0_i32, %c0_i32_0 : i32, i32
  }
  func.func @transform_14(%arg0: i32) -> (i32, i32) {
    %c0_i32 = arith.constant 0 : i32
    %c0_i32_0 = arith.constant 0 : i32
    %c0_i32_1 = arith.constant 0 : i32
    return %c0_i32, %c0_i32_0 : i32, i32
  }
  func.func @transform_15(%arg0: i32) -> (i32, i32) {
    %c0_i32 = arith.constant 0 : i32
    %c0_i32_0 = arith.constant 0 : i32
    return %arg0, %c0_i32 : i32, i32
  }
}

</mosaic_0001>

<bundles_post_ra>
// kernel: newstnet_forward.1
= control target key start
LH: loop header
LB: loop body
LE: loop exit
PB: predicated region body
PF: predicated region fallthrough
CT: control target
= control target key end

     0   :  { %20 = vsyncpa [#allocation3], 0  ;;  %s1890_s0 = inlined_call_operand.hbm [shape: f32[8,32], index: 0, kind: input, shape index: {}]   ;;  %s1891_s1 = inlined_call_operand.hbm [shape: bf16[32,64], index: 1, kind: input, shape index: {}]   ;;  %s1892_s2 = inlined_call_operand.hbm [shape: f32[1,64], index: 2, kind: input, shape index: {}]   ;;  %s1893_s3 = inlined_call_operand.hbm [shape: bf16[64,128], index: 3, kind: input, shape index: {}]   ;;  %s1894_s4 = inlined_call_operand.hbm [shape: f32[1,128], index: 4, kind: input, shape index: {}]   ;;  %s1895_s5 = inlined_call_operand.vmem [shape: bf16[128,256], index: 5, kind: input, shape index: {}]   ;;  %s1896_s6 = inlined_call_operand.hbm [shape: f32[1,256], index: 6, kind: input, shape index: {}]   ;;  %s1897_s7 = inlined_call_operand.hbm [shape: bf16[256,256], index: 7, kind: input, shape index: {}]   ;;  %s1898_s8 = inlined_call_operand.hbm [shape: f32[1,256], index: 8, kind: input, shape index: {}]   ;;  %s1899_s9 = inlined_call_operand.hbm [shape: bf16[256,128], index: 9, kind: input, shape index: {}]   ;;  %s1900_s10 = inlined_call_operand.vmem [shape: f32[1,128], index: 10, kind: input, shape index: {}]   ;;  %s1901_s11 = inlined_call_operand.vmem [shape: bf16[128,64], index: 11, kind: input, shape index: {}]   ;;  %s1902_s12 = inlined_call_operand.vmem [shape: f32[1,64], index: 12, kind: input, shape index: {}]   ;;  %s1903_s13 = inlined_call_operand.vmem [shape: bf16[64,32], index: 13, kind: input, shape index: {}]   ;;  %s1904_s14 = inlined_call_operand.vmem [shape: f32[1,32], index: 14, kind: input, shape index: {}]   ;;  %s1905_s15 = inlined_call_operand.hbm [shape: f32[8,32], index: 15, kind: output, shape index: {}]  }
   0x1   :  { %21 = vsyncpa [#allocation6], 0 }
   0x2   :  { %22 = vsyncpa [#allocation9], 0 }
   0x3   :  { %23 = vsyncpa [#allocation12], 0 }
   0x4   :  { %24 = vsyncpa [#allocation15], 0 }
   0x5   :  { %25 = vsyncpa [#allocation4], 0  ;;  %s1631_s18 = smov [#allocation5]  }
   0x6   :  { %s41_s19 = sshll.u32 %s1631_s18, 4  ;;  %s42_s19 = int_to_ptr.vmem [resolvable:$true] %s41_s19 }
   0x7   :  { %s1427_s20 = scalar_lea.vmem %s42_s19, 256  ;;  %p1432_p1 = scmp.lt.s32.totalorder %s42_s19, %s42_s19 }
   0x8   :  { %p1428_p0 = scmp.ne.s32.totalorder %s42_s19, %s1427_s20  ;;  %p1433_p2 = scmp.lt.s32.totalorder %s1427_s20, %s1427_s20 }
   0xa   :  { %p1434_p3 = por %p1433_p2, %p1432_p1 }
   0xc   :  { %p1435_p4 = pnand %p1434_p3, %p1428_p0 }
   0xe   :  { %1438 = shalt.err (!%p1435_p4)
}
   0xf   :  { %s1632_s21 = smov 64   ;;  %s1633_s22 = smov 4  }
  0x10   :  { %47 = dma.hbm_to_vmem [thread:$0]  %s1891_s1, 256, %s42_s19, [#allocation6], %s1632_s21, %s1632_s21, %s1633_s22  }
  0x11   :  { %s1634_s25 = smov [#allocation8]   ;;  %s1635_s27 = smov [#allocation11]  }
  0x12   :  { %s63_s26 = sshll.u32 %s1634_s25, 4  ;;  %s88_s28 = sshll.u32 %s1635_s27, 4  ;;  %s64_s26 = int_to_ptr.vmem [resolvable:$true] %s63_s26  ;;  %s89_s28 = int_to_ptr.vmem [resolvable:$true] %s88_s28 }
  0x13   :  { %s1447_s29 = scalar_lea.vmem %s64_s26, 512  ;;  %p1452_p6 = scmp.lt.s32.totalorder %s64_s26, %s64_s26 }
  0x14   :  { %p1448_p5 = scmp.ne.s32.totalorder %s64_s26, %s1447_s29  ;;  %p1453_p7 = scmp.lt.s32.totalorder %s1447_s29, %s1447_s29 }
  0x16   :  { %p1454_p8 = por %p1453_p7, %p1452_p6 }
  0x18   :  { %p1455_p9 = pnand %p1454_p8, %p1448_p5 }
  0x1a   :  { %1458 = shalt.err (!%p1455_p9)
}
  0x1b   :  { %69 = dma.hbm_to_vmem [thread:$0]  %s1893_s3, 512, %s64_s26, [#allocation9], %s1632_s21, %s1632_s21, %s1633_s22  }
  0x1c   :  { %s1467_s1 = scalar_lea.vmem %s89_s28, 32  ;;  %p1472_p11 = scmp.lt.s32.totalorder %s89_s28, %s89_s28 }
  0x1d   :  { %p1468_p10 = scmp.ne.s32.totalorder %s89_s28, %s1467_s1  ;;  %p1473_p12 = scmp.lt.s32.totalorder %s1467_s1, %s1467_s1 }
  0x1f   :  { %p1474_p13 = por %p1473_p12, %p1472_p11 }
  0x21   :  { %p1475_p0 = pnand %p1474_p13, %p1468_p10 }
  0x23   :  { %1478 = shalt.err (!%p1475_p0)
}
  0x24   :  { %91 = dma.hbm_to_vmem [thread:$0]  %s1896_s6, 32, %s89_s28, [#allocation12]  }
  0x25   :  { %s1636_s19 = smov [#allocation14]   ;;  %s1637_s23 = smov [#allocation2]  }
  0x26   :  { %s110_s20 = sshll.u32 %s1636_s19, 4  ;;  %s32_s24 = sshll.u32 %s1637_s23, 4  ;;  %s111_s20 = int_to_ptr.vmem [resolvable:$true] %s110_s20  ;;  %s33_s24 = int_to_ptr.vmem [resolvable:$true] %s32_s24 }
  0x27   :  { %s1487_s25 = scalar_lea.vmem %s111_s20, 32  ;;  %p1492_p2 = scmp.lt.s32.totalorder %s111_s20, %s111_s20 }
  0x28   :  { %p1488_p1 = scmp.ne.s32.totalorder %s111_s20, %s1487_s25  ;;  %p1493_p3 = scmp.lt.s32.totalorder %s1487_s25, %s1487_s25 }
  0x2a   :  { %p1494_p4 = por %p1493_p3, %p1492_p2 }
  0x2c   :  { %p1495_p5 = pnand %p1494_p4, %p1488_p1 }
  0x2e   :  { %1498 = shalt.err (!%p1495_p5)
}
  0x2f   :  { %113 = dma.hbm_to_vmem [thread:$0]  %s1898_s8, 32, %s111_s20, [#allocation15]  }
  0x30   :  { %s1507_s27 = scalar_lea.vmem %s33_s24, 128  ;;  %p1512_p7 = scmp.lt.s32.totalorder %s33_s24, %s33_s24 }
  0x31   :  { %p1508_p6 = scmp.ne.s32.totalorder %s33_s24, %s1507_s27  ;;  %p1513_p8 = scmp.lt.s32.totalorder %s1507_s27, %s1507_s27 }
  0x33   :  { %p1514_p9 = por %p1513_p8, %p1512_p7 }
  0x35   :  { %p1515_p10 = pnand %p1514_p9, %p1508_p6 }
  0x37   :  { %1518 = shalt.err (!%p1515_p10)
}
  0x38   :  { %35 = dma.hbm_to_vmem [thread:$0]  %s1890_s0, 128, %s33_s24, [#allocation3]  }
  0x39   :  { %s1638_s29 = smov [#allocation7]   ;;  %s1639_s16 = smov [#allocation10]  }
  0x3a   :  { %s54_s30 = sshll.u32 %s1638_s29, 4  ;;  %s76_s1 = sshll.u32 %s1639_s16, 4  ;;  %s55_s30 = int_to_ptr.vmem [resolvable:$true] %s54_s30  ;;  %s77_s1 = int_to_ptr.vmem [resolvable:$true] %s76_s1 }
  0x3b   :  { %s1527_s17 = scalar_lea.vmem %s55_s30, 16  ;;  %s1531_s8 = scalar_lea.vmem %s55_s30, 32 }
  0x3c   :  { %p1528_p11 = scmp.ne.s32.totalorder %s55_s30, %s1527_s17  ;;  %p1532_p12 = scmp.lt.s32.totalorder %s55_s30, %s55_s30 }
  0x3d   :  { %p1533_p13 = scmp.lt.s32.totalorder %s1531_s8, %s1527_s17 }
  0x3f   :  { %p1534_p0 = por %p1533_p13, %p1532_p12 }
  0x41   :  { %p1535_p1 = pnand %p1534_p0, %p1528_p11 }
  0x43   :  { %1538 = shalt.err (!%p1535_p1)
}
  0x44   :  { %57 = dma.hbm_to_vmem [thread:$0]  %s1892_s2, 16, %s55_s30, [#allocation6]  }
  0x45   :  { %s1547_s20 = scalar_lea.vmem %s77_s1, 16  ;;  %s1551_s0 = scalar_lea.vmem %s77_s1, 32 }
  0x46   :  { %p1548_p2 = scmp.ne.s32.totalorder %s77_s1, %s1547_s20  ;;  %p1552_p3 = scmp.lt.s32.totalorder %s77_s1, %s77_s1 }
  0x47   :  { %p1553_p4 = scmp.lt.s32.totalorder %s1551_s0, %s1547_s20 }
  0x49   :  { %p1554_p5 = por %p1553_p4, %p1552_p3 }
  0x4b   :  { %p1555_p6 = pnand %p1554_p5, %p1548_p2 }
  0x4d   :  { %1558 = shalt.err (!%p1555_p6)
}
  0x4e   :  { %79 = dma.hbm_to_vmem [thread:$0]  %s1894_s4, 16, %s77_s1, [#allocation9]  }
  0x4f   :  { %s1640_s25 = smov [#allocation13]  }
  0x50   :  { %s97_s3 = sshll.u32 %s1640_s25, 4  ;;  %s98_s3 = int_to_ptr.vmem [resolvable:$true] %s97_s3 }
  0x51   :  { %s1567_s26 = scalar_lea.vmem %s98_s3, 4096  ;;  %p1572_p8 = scmp.lt.s32.totalorder %s98_s3, %s98_s3 }
  0x52   :  { %p1568_p7 = scmp.ne.s32.totalorder %s98_s3, %s1567_s26  ;;  %p1573_p9 = scmp.lt.s32.totalorder %s1567_s26, %s1567_s26 }
  0x54   :  { %p1574_p10 = por %p1573_p9, %p1572_p8 }
  0x56   :  { %p1575_p11 = pnand %p1574_p10, %p1568_p7 }
  0x58   :  { %1578 = shalt.err (!%p1575_p11)
}
  0x59   :  { %s1641_s2 = smov 128   ;;  %s1642_s27 = smov 8  }
  0x5a   :  { %103 = dma.hbm_to_vmem [thread:$0]  %s1897_s7, 4096, %s98_s3, [#allocation12], %s1641_s2, %s1641_s2, %s1642_s27  }
  0x5b   :  { %s1643_s29 = smov [#allocation16]  }
  0x5c   :  { %s119_s30 = sshll.u32 %s1643_s29, 4  ;;  %s120_s30 = int_to_ptr.vmem [resolvable:$true] %s119_s30 }
  0x5d   :  { %s1587_s4 = scalar_lea.vmem %s120_s30, 2048  ;;  %p1592_p13 = scmp.lt.s32.totalorder %s120_s30, %s120_s30 }
  0x5e   :  { %p1588_p12 = scmp.ne.s32.totalorder %s120_s30, %s1587_s4  ;;  %p1593_p0 = scmp.lt.s32.totalorder %s1587_s4, %s1587_s4 }
  0x60   :  { %p1594_p1 = por %p1593_p0, %p1592_p13 }
  0x62   :  { %p1595_p2 = pnand %p1594_p1, %p1588_p12 }
  0x64   :  { %1598 = shalt.err (!%p1595_p2)
}
  0x65   :  { %125 = dma.hbm_to_vmem [thread:$0]  %s1899_s9, 2048, %s120_s30, [#allocation15], %s1632_s21, %s1632_s21, %s1633_s22  }
  0x66   :  { %1619 = dma.done.wait [#allocation3], 128  }
  0x67   :  { %1620 = vsyncadd [#allocation3], 4294967168 }
  0x68   :  { %1621 = dma.done.wait [#allocation6], 272  }
  0x69   :  { %1622 = vsyncadd [#allocation6], 4294967024 }
  0x6a   :  { %1623 = dma.done.wait [#allocation9], 528  }
  0x6b   :  { %1624 = vsyncadd [#allocation9], 4294966768 }
  0x6c   :  { %1625 = dma.done.wait [#allocation12], 4128  }
  0x6d   :  { %1626 = vsyncadd [#allocation12], 4294963168 }
  0x6e   :  { %1627 = dma.done.wait [#allocation15], 2080  }
  0x6f   :  { %1628 = vsyncadd [#allocation15], 4294965216  ;;  %v1644_v0 = vmov 0.0   ;;  %vm1645_vm0 = vmmov 0   ;;  %v1313_v1 = vld [vmem:[#allocation5 + $0x8] sm:$0xff]   ;;  %v1314_v2 = vld [vmem:[#allocation5] sm:$0xff]  }
  0x70   :  { %1244 = vmatprep.subr.bf16.mxu0 %v1644_v0  ;;  %1248 = vmatprep.mubr.msk.bf16.mxu0 %vm1645_vm0, %v1644_v0  ;;  %v164_v3 = vld [vmem:[#allocation2] sm:$0xff]  ;;  %v1315_v4 = vld [vmem:[#allocation8 + $0x18] sm:$0xff]   ;;  %v1316_v6 = vld [vmem:[#allocation8 + $0x10] sm:$0xff]   ;;  %vm189_vm1 = vcmask 261120   ;;  %vm273_vm2 = vcmask 523264   ;;  %v1646_v32 = vmov 0  }
  0x71   :  { %1252 = vmatprep.subr.bf16.mxu1 %v1644_v0  ;;  %1260 = vmatprep.mubr.msk.bf16.mxu1 %vm1645_vm0, %v1644_v0  ;;  %v170_v5 = vpack.c.bf16 %v164_v3, %v164_v3  ;;  %v1317_v7 = vld [vmem:[#allocation8 + $0x8] sm:$0xff]   ;;  %v1318_v8 = vld [vmem:[#allocation8] sm:$0xff]   ;;  %v1110_v23 = vld [vmem:[#allocation7] ss:$0 sm:$0xff]  ;;  %s1647_s23 = smov [#allocation17]  }
  0x72   :  { %1245 = vmatpush3.bf16.msra.mxu0 %v1313_v1  ;;  %1253 = vmatpush3.bf16.msra.mxu1 %v1315_v4  ;;  %v1319_v9 = vld [vmem:[%s1895_s5 + $0x70] ss:$8 sps:$4 sm:$0xff]   ;;  %v1321_v10 = vld [vmem:[%s1895_s5 + $0x74] ss:$8 sps:$4 sm:$0xff]   ;;  %v1324_v11 = vld [vmem:[%s1895_s5 + $0x64] ss:$8 sps:$4 sm:$0xff]  }
  0x73   :  { %1246 = vmatprep.subr.bf16.mxu0 %v1644_v0  ;;  %1254 = vmatprep.subr.bf16.mxu1 %v1644_v0  ;;  %v1322_v12 = vld [vmem:[%s1895_s5 + $0x60] ss:$8 sps:$4 sm:$0xff]   ;;  %v1327_v13 = vld [vmem:[%s1895_s5 + $0x54] ss:$8 sps:$4 sm:$0xff]   ;;  %v1325_v14 = vld [vmem:[%s1895_s5 + $0x50] ss:$8 sps:$4 sm:$0xff]  }
  0x74   :  { %v1330_v15 = vld [vmem:[%s1895_s5 + $0x44] ss:$8 sps:$4 sm:$0xff]   ;;  %v1328_v16 = vld [vmem:[%s1895_s5 + $0x40] ss:$8 sps:$4 sm:$0xff]   ;;  %v1333_v17 = vld [vmem:[%s1895_s5 + $0x34] ss:$8 sps:$4 sm:$0xff]  }
  0x75   :  { %v1331_v18 = vld [vmem:[%s1895_s5 + $0x30] ss:$8 sps:$4 sm:$0xff]   ;;  %v1336_v19 = vld [vmem:[%s1895_s5 + $0x24] ss:$8 sps:$4 sm:$0xff]   ;;  %v1334_v20 = vld [vmem:[%s1895_s5 + $0x20] ss:$8 sps:$4 sm:$0xff]  }
  0x76   :  { %1247 = vmatpush3.bf16.msra.mxu0 %v1314_v2  ;;  %1255 = vmatpush3.bf16.msra.mxu1 %v1316_v6  ;;  %v1339_v21 = vld [vmem:[%s1895_s5 + $0x14] ss:$8 sps:$4 sm:$0xff]   ;;  %v1337_v22 = vld [vmem:[%s1895_s5 + $0x10] ss:$8 sps:$4 sm:$0xff]   ;;  %v1342_v30 = vld [vmem:[%s1895_s5 + $0x4] ss:$8 sps:$4 sm:$0xff]  }
  0x77   :  { %1256 = vmatprep.subr.bf16.mxu1 %v1644_v0  ;;  %427 = vmatprep.subr.bf16.mxu0 %v1321_v10  ;;  %v1340_v31 = vld [vmem:[%s1895_s5] ss:$8 sps:$4 sm:$0xff]   ;;  %v1343_v33 = vld [vmem:[#allocation13 + $0x70] ss:$8 sps:$4 sm:$0xff]   ;;  %v1345_v34 = vld [vmem:[#allocation13 + $0x74] ss:$8 sps:$4 sm:$0xff]  }
  0x78   :  { %v1348_v35 = vld [vmem:[#allocation13 + $0x64] ss:$8 sps:$4 sm:$0xff]   ;;  %v1346_v36 = vld [vmem:[#allocation13 + $0x60] ss:$8 sps:$4 sm:$0xff]   ;;  %v1351_v37 = vld [vmem:[#allocation13 + $0x54] ss:$8 sps:$4 sm:$0xff]  }
  0x79   :  { %1249 = vmatmul.mubr.msk.bf16.vlgmr.msra.gmra.mxu0 %vm189_vm1, %v170_v5  ;;  %v1349_v38 = vld [vmem:[#allocation13 + $0x50] ss:$8 sps:$4 sm:$0xff]   ;;  %v1354_v39 = vld [vmem:[#allocation13 + $0x44] ss:$8 sps:$4 sm:$0xff]   ;;  %v1352_v40 = vld [vmem:[#allocation13 + $0x40] ss:$8 sps:$4 sm:$0xff]  }
  0x7a   :  { %1257 = vmatpush3.bf16.msra.mxu1 %v1317_v7  ;;  %428 = vmatpush1.bf16.msra.mxu0 %v1319_v9  ;;  %v1357_v41 = vld [vmem:[#allocation13 + $0x34] ss:$8 sps:$4 sm:$0xff]   ;;  %v1355_v42 = vld [vmem:[#allocation13 + $0x30] ss:$8 sps:$4 sm:$0xff]   ;;  %v1360_v43 = vld [vmem:[#allocation13 + $0x24] ss:$8 sps:$4 sm:$0xff]  }
  0x7b   :  { %1258 = vmatprep.subr.bf16.mxu1 %v1644_v0  ;;  %429 = vmatprep.subr.bf16.mxu0 %v1324_v11  ;;  %v1358_v44 = vld [vmem:[#allocation13 + $0x20] ss:$8 sps:$4 sm:$0xff]   ;;  %v1363_v45 = vld [vmem:[#allocation13 + $0x14] ss:$8 sps:$4 sm:$0xff]   ;;  %v1361_v46 = vld [vmem:[#allocation13 + $0x10] ss:$8 sps:$4 sm:$0xff]  }
  0x7c   :  { %459 = vmatprep.mubr.bf16.mxu0 %v1646_v32  ;;  %v1366_v47 = vld [vmem:[#allocation13 + $0x4] ss:$8 sps:$4 sm:$0xff]   ;;  %v1364_v48 = vld [vmem:[#allocation13] ss:$8 sps:$4 sm:$0xff]   ;;  %v1369_v49 = vld [vmem:[#allocation13 + $0xf4] ss:$8 sps:$4 sm:$0xff]  }
  0x7d   :  { %v1367_v50 = vld [vmem:[#allocation13 + $0xf0] ss:$8 sps:$4 sm:$0xff]   ;;  %v1372_v51 = vld [vmem:[#allocation13 + $0xe4] ss:$8 sps:$4 sm:$0xff]   ;;  %v1370_v52 = vld [vmem:[#allocation13 + $0xe0] ss:$8 sps:$4 sm:$0xff]  }
  0x7e   :  { %1259 = vmatpush3.bf16.msra.mxu1 %v1318_v8  ;;  %430 = vmatpush1.bf16.msra.mxu0 %v1322_v12  ;;  %v1375_v53 = vld [vmem:[#allocation13 + $0xd4] ss:$8 sps:$4 sm:$0xff]   ;;  %v1373_v54 = vld [vmem:[#allocation13 + $0xd0] ss:$8 sps:$4 sm:$0xff]   ;;  %v1378_v55 = vld [vmem:[#allocation13 + $0xc4] ss:$8 sps:$4 sm:$0xff]  }
  0x7f   :  { %431 = vmatprep.subr.bf16.mxu0 %v1327_v13  ;;  %674 = vmatprep.subr.bf16.mxu1 %v1345_v34  ;;  %v1376_v56 = vld [vmem:[#allocation13 + $0xc0] ss:$8 sps:$4 sm:$0xff]   ;;  %v1381_v57 = vld [vmem:[#allocation13 + $0xb4] ss:$8 sps:$4 sm:$0xff]   ;;  %v1379_v58 = vld [vmem:[#allocation13 + $0xb0] ss:$8 sps:$4 sm:$0xff]  }
  0x80   :  { %v1384_v59 = vld [vmem:[#allocation13 + $0xa4] ss:$8 sps:$4 sm:$0xff]   ;;  %v1382_v60 = vld [vmem:[#allocation13 + $0xa0] ss:$8 sps:$4 sm:$0xff]   ;;  %v1114_v61 = vld [vmem:[#allocation10] ss:$0 sm:$0xff] }
  0x81   :  { %v1387_v6 = vld [vmem:[#allocation13 + $0x94] ss:$8 sps:$4 sm:$0xff]   ;;  %v1385_v7 = vld [vmem:[#allocation13 + $0x90] ss:$8 sps:$4 sm:$0xff]   ;;  %v1390_v8 = vld [vmem:[#allocation13 + $0x84] ss:$8 sps:$4 sm:$0xff]  }
  0x82   :  { %432 = vmatpush1.bf16.msra.mxu0 %v1325_v14  ;;  %v1388_v9 = vld [vmem:[#allocation13 + $0x80] ss:$8 sps:$4 sm:$0xff]   ;;  %v1393_v12 = vld [vmem:[#allocation16 + $0x70] sm:$0xff]  }
  0x83   :  { %433 = vmatprep.subr.bf16.mxu0 %v1330_v15  ;;  %v1391_v10 = vld [vmem:[#allocation16 + $0x78] sm:$0xff]   ;;  %v1394_v13 = vld [vmem:[#allocation16 + $0x30] sm:$0xff]   ;;  %v1395_v14 = vld [vmem:[#allocation16 + $0x68] sm:$0xff]  }
  0x84   :  { %v1392_v11 = vld [vmem:[#allocation16 + $0x38] sm:$0xff]   ;;  %v1396_v15 = vld [vmem:[#allocation16 + $0x28] sm:$0xff]  }
  0x86   :  { %434 = vmatpush1.bf16.msra.mxu0 %v1328_v16  ;;  %v1397_v16 = vld [vmem:[#allocation16 + $0x60] sm:$0xff]  }
  0x87   :  { %435 = vmatprep.subr.bf16.mxu0 %v1333_v17  ;;  %v1398_v17 = vld [vmem:[#allocation16 + $0x20] sm:$0xff]  }
  0x8a   :  { %436 = vmatpush1.bf16.msra.mxu0 %v1331_v18  ;;  %v1399_v18 = vld [vmem:[#allocation16 + $0x58] sm:$0xff]  }
  0x8b   :  { %437 = vmatprep.subr.bf16.mxu0 %v1336_v19  ;;  %v1400_v19 = vld [vmem:[#allocation16 + $0x18] sm:$0xff]  }
  0x8e   :  { %438 = vmatpush1.bf16.msra.mxu0 %v1334_v20  ;;  %v1401_v20 = vld [vmem:[#allocation16 + $0x50] sm:$0xff]  }
  0x8f   :  { %439 = vmatprep.subr.bf16.mxu0 %v1339_v21  ;;  %v1402_v21 = vld [vmem:[#allocation16 + $0x10] sm:$0xff]  }
  0x92   :  { %440 = vmatpush1.bf16.msra.mxu0 %v1337_v22  ;;  %v337_v22 = vlaneseq }
  0x93   :  { %441 = vmatprep.subr.bf16.mxu0 %v1342_v30 }
  0x96   :  { %442 = vmatpush1.bf16.msra.mxu0 %v1340_v31 }
  0x97   :  { %1208 = vmatprep.subr.bf16.mxu0 %v1391_v10  ;;  %v1418_v10 = vld [vmem:[%s1903_s13] sm:$0xff]  }
 0x139   :  { %v227_v24 = vpop.f32.mrf.mxu0 }
 0x13a   :  { %v228_v25 = vadd.f32 %v1110_v23, %v227_v24  ;;  %v338_v23 = vshrl.u32 %v337_v22, 7 }
 0x13b   :  { %v1250_v26 = vpop.f32.mrf.mxu0 }
 0x13c   :  { %v242_v27 = vpack.c.bf16 %v228_v25, %v228_v25  ;;  %v339_v24 = vsub.s32 0, %v338_v23  ;;  %v334_v25 = vld [vmem:[#allocation11] sm:$0x3]  ;;  %v343_v26 = vsub.s32 1, %v338_v23 }
 0x13d   :  { %v230_v28 = vpop.f32.mrf.mxu0 }
 0x13e   :  { %1261 = vmatmul.mubr.msk.bf16.vlgmr.msra.gmra.mxu1 %vm273_vm2, %v242_v27  ;;  %v340_v27 = vrot.slane %v334_v25, %v339_v24  ;;  %v344_v28 = vrot.slane %v334_v25, %v343_v26 }
 0x13f   :  { %v1251_v29 = vpop.f32.mrf.mxu0  ;;  %675 = vmatpush1.bf16.msra.mxu1 %v1343_v33 }
 0x140   :  { %676 = vmatprep.subr.bf16.mxu1 %v1348_v35 }
 0x143   :  { %677 = vmatpush1.bf16.msra.mxu1 %v1346_v36 }
 0x144   :  { %678 = vmatprep.subr.bf16.mxu1 %v1351_v37  ;;  %v1403_v37 = vld [vmem:[#allocation16 + $0x48] sm:$0xff]  }
 0x147   :  { %679 = vmatpush1.bf16.msra.mxu1 %v1349_v38  ;;  %v1404_v38 = vld [vmem:[#allocation16 + $0x8] sm:$0xff]  }
 0x148   :  { %680 = vmatprep.subr.bf16.mxu1 %v1354_v39  ;;  %v1405_v39 = vld [vmem:[#allocation16 + $0x40] sm:$0xff]  }
 0x14b   :  { %681 = vmatpush1.bf16.msra.mxu1 %v1352_v40  ;;  %v1406_v40 = vld [vmem:[#allocation16] sm:$0xff]  }
 0x14c   :  { %682 = vmatprep.subr.bf16.mxu1 %v1357_v41  ;;  %v500_v41 = vld [vmem:[#allocation14] sm:$0x3] }
 0x14f   :  { %683 = vmatpush1.bf16.msra.mxu1 %v1355_v42  ;;  %v507_v42 = vrot.slane %v500_v41, %v339_v24 }
 0x150   :  { %684 = vmatprep.subr.bf16.mxu1 %v1360_v43  ;;  %v511_v43 = vrot.slane %v500_v41, %v343_v26 }
 0x153   :  { %685 = vmatpush1.bf16.msra.mxu1 %v1358_v44 }
 0x154   :  { %686 = vmatprep.subr.bf16.mxu1 %v1363_v45 }
 0x157   :  { %687 = vmatpush1.bf16.msra.mxu1 %v1361_v46 }
 0x158   :  { %688 = vmatprep.subr.bf16.mxu1 %v1366_v47 }
 0x15b   :  { %689 = vmatpush1.bf16.msra.mxu1 %v1364_v48 }
 0x15c   :  { %690 = vmatprep.subr.bf16.mxu1 %v1369_v49 }
 0x15f   :  { %691 = vmatpush2.bf16.msra.mxu1 %v1367_v50 }
 0x160   :  { %692 = vmatprep.subr.bf16.mxu1 %v1372_v51 }
 0x163   :  { %693 = vmatpush2.bf16.msra.mxu1 %v1370_v52 }
 0x164   :  { %694 = vmatprep.subr.bf16.mxu1 %v1375_v53  ;;  %v1407_v53 = vld [vmem:[%s1901_s11 + $0x38] sm:$0xff]  }
 0x167   :  { %695 = vmatpush2.bf16.msra.mxu1 %v1373_v54 }
 0x168   :  { %696 = vmatprep.subr.bf16.mxu1 %v1378_v55  ;;  %v1408_v55 = vld [vmem:[%s1901_s11 + $0x30] sm:$0xff]  }
 0x16b   :  { %697 = vmatpush2.bf16.msra.mxu1 %v1376_v56  ;;  %v1409_v56 = vld [vmem:[%s1901_s11 + $0x28] sm:$0xff]  }
 0x16c   :  { %698 = vmatprep.subr.bf16.mxu1 %v1381_v57  ;;  %v1410_v57 = vld [vmem:[%s1901_s11 + $0x20] sm:$0xff]  }
 0x16f   :  { %699 = vmatpush2.bf16.msra.mxu1 %v1379_v58  ;;  %v1411_v58 = vld [vmem:[%s1901_s11 + $0x18] sm:$0xff]  }
 0x170   :  { %700 = vmatprep.subr.bf16.mxu1 %v1384_v59  ;;  %v1412_v59 = vld [vmem:[%s1901_s11 + $0x10] sm:$0xff]  }
 0x173   :  { %701 = vmatpush2.bf16.msra.mxu1 %v1382_v60  ;;  %v1413_v60 = vld [vmem:[%s1901_s11 + $0x8] sm:$0xff]  }
 0x174   :  { %702 = vmatprep.subr.bf16.mxu1 %v1387_v6 }
 0x177   :  { %703 = vmatpush2.bf16.msra.mxu1 %v1385_v7 }
 0x178   :  { %704 = vmatprep.subr.bf16.mxu1 %v1390_v8 }
 0x17b   :  { %705 = vmatpush2.bf16.msra.mxu1 %v1388_v9  ;;  %v1417_v9 = vld [vmem:[%s1903_s13 + $0x8] sm:$0xff]  }
 0x17c   :  { %1284 = vmatprep.subr.bf16.mxu1 %v1644_v0 }
 0x1fe   :  { %v311_v62 = vpop.f32.mrf.mxu1 }
 0x1ff   :  { %v312_v63 = vadd.f32 %v1114_v61, %v311_v62  ;;  %v1414_v61 = vld [vmem:[%s1901_s11] sm:$0xff]   ;;  %v1415_v62 = vld [vmem:[%s1903_s13 + $0x18] sm:$0xff]  }
 0x200   :  { %v1262_v1 = vpop.f32.mrf.mxu1 }
 0x201   :  { %v317_v2 = vmax.f32 %v312_v63, 0.0  ;;  %v1416_v63 = vld [vmem:[%s1903_s13 + $0x10] sm:$0xff]   ;;  %s1097_s13 = sshll.u32 %s1647_s23, 4  ;;  %s1098_s13 = int_to_ptr.vmem [resolvable:$true] %s1097_s13 }
 0x202   :  { %v314_v3 = vpop.f32.mrf.mxu1  ;;  %p1604_p4 = scmp.lt.s32.totalorder %s1098_s13, %s1098_s13 }
 0x203   :  { %v335_v4 = vpack.c.bf16 %v317_v2, %v317_v2  ;;  %v1168_v2 = vld [vmem:[%s1900_s10] ss:$0 sm:$0xff] }
 0x204   :  { %v1263_v5 = vpop.f32.mrf.mxu1 }
 0x205   :  { %460 = vmatmul.mubr.bf16.vlgmr.msra.gmra.mxu0 %v335_v4 }
 0x206   :  { %1209 = vmatpush3.bf16.msra.mxu0 %v1392_v11  ;;  %v1185_v11 = vld [vmem:[%s1902_s12] ss:$0 sm:$0xff]  ;;  %s1599_s12 = scalar_lea.vmem %s1098_s13, 128 }
 0x207   :  { %1210 = vmatprep.subr.bf16.mxu0 %v1393_v12  ;;  %p1600_p3 = scmp.ne.s32.totalorder %s1098_s13, %s1599_s12  ;;  %p1605_p5 = scmp.lt.s32.totalorder %s1599_s12, %s1599_s12 }
 0x209   :  { %p1606_p6 = por %p1605_p5, %p1604_p4 }
 0x20a   :  { %1211 = vmatpush3.bf16.msra.mxu0 %v1394_v13 }
 0x20b   :  { %1212 = vmatprep.subr.bf16.mxu0 %v1395_v14  ;;  %p1607_p7 = pnand %p1606_p6, %p1600_p3 }
 0x20e   :  { %1213 = vmatpush3.bf16.msra.mxu0 %v1396_v15 }
 0x20f   :  { %1214 = vmatprep.subr.bf16.mxu0 %v1397_v16 }
 0x212   :  { %1215 = vmatpush3.bf16.msra.mxu0 %v1398_v17 }
 0x213   :  { %1216 = vmatprep.subr.bf16.mxu0 %v1399_v18 }
 0x216   :  { %1217 = vmatpush3.bf16.msra.mxu0 %v1400_v19 }
 0x217   :  { %1218 = vmatprep.subr.bf16.mxu0 %v1401_v20 }
 0x21a   :  { %1219 = vmatpush3.bf16.msra.mxu0 %v1402_v21 }
 0x21b   :  { %1220 = vmatprep.subr.bf16.mxu0 %v1403_v37 }
 0x21e   :  { %1221 = vmatpush3.bf16.msra.mxu0 %v1404_v38 }
 0x21f   :  { %1222 = vmatprep.subr.bf16.mxu0 %v1405_v39 }
 0x222   :  { %1223 = vmatpush3.bf16.msra.mxu0 %v1406_v40 }
 0x223   :  { %1264 = vmatprep.subr.bf16.mxu0 %v1644_v0 }
 0x2c5   :  { %v461_v29 = vpop.f32.mrf.mxu0 }
 0x2c6   :  { %v462_v30 = vadd.f32 %v461_v29, %v340_v27 }
 0x2c7   :  { %v463_v31 = vpop.f32.mrf.mxu0 }
 0x2c8   :  { %v464_v32 = vadd.f32 %v463_v31, %v344_v28  ;;  %v501_v35 = vpack.c.bf16 %v462_v30, %v462_v30 }
 0x2c9   :  { %v465_v33 = vpop.f32.mrf.mxu0 }
 0x2ca   :  { %v502_v34 = vpack.c.bf16 %v464_v32, %v464_v32 }
 0x2cb   :  { %v466_v36 = vpop.f32.mrf.mxu0 }
 0x2cc   :  { %706 = vmatprep.mubr.bf16.mxu1 %v502_v34 }
 0x2cd   :  { %707 = vmatmul.mubr.bf16.vlgmr.msra.gmra.mxu1 %v501_v35 }
 0x2ce   :  { %1292 = vmatprep.mubr.msk.bf16.mxu1 %vm1645_vm0, %v1644_v0  ;;  %1285 = vmatpush3.bf16.msra.mxu1 %v1415_v62 }
 0x2cf   :  { %1286 = vmatprep.subr.bf16.mxu1 %v1644_v0 }
 0x2d2   :  { %1287 = vmatpush3.bf16.msra.mxu1 %v1416_v63 }
 0x2d3   :  { %1288 = vmatprep.subr.bf16.mxu1 %v1644_v0 }
 0x2d6   :  { %1289 = vmatpush3.bf16.msra.mxu1 %v1417_v9 }
 0x2d7   :  { %1290 = vmatprep.subr.bf16.mxu1 %v1644_v0 }
 0x2da   :  { %1291 = vmatpush3.bf16.msra.mxu1 %v1418_v10 }
 0x38d   :  { %v708_v44 = vpop.f32.mrf.mxu1 }
 0x38e   :  { %v709_v45 = vadd.f32 %v708_v44, %v507_v42 }
 0x38f   :  { %v710_v46 = vpop.f32.mrf.mxu1 }
 0x390   :  { %v711_v47 = vadd.f32 %v710_v46, %v511_v43  ;;  %v715_v48 = vmax.f32 %v709_v45, 0.0 }
 0x391   :  { %v712_v49 = vpop.f32.mrf.mxu1 }
 0x392   :  { %v716_v50 = vmax.f32 %v711_v47, 0.0  ;;  %v750_v54 = vpack.c.bf16 %v715_v48, %v715_v48 }
 0x393   :  { %v713_v51 = vpop.f32.mrf.mxu1 }
 0x394   :  { %v751_v52 = vpack.c.bf16 %v716_v50, %v716_v50 }
 0x396   :  { %886 = vmatprep.mubr.bf16.mxu0 %v751_v52 }
 0x397   :  { %887 = vmatmul.mubr.bf16.vlgmr.msra.gmra.mxu0 %v750_v54 }
 0x398   :  { %1265 = vmatpush3.bf16.msra.mxu0 %v1407_v53  ;;  %1280 = vmatprep.mubr.msk.bf16.mxu0 %vm1645_vm0, %v1644_v0 }
 0x399   :  { %1266 = vmatprep.subr.bf16.mxu0 %v1644_v0 }
 0x39c   :  { %1267 = vmatpush3.bf16.msra.mxu0 %v1408_v55 }
 0x39d   :  { %1268 = vmatprep.subr.bf16.mxu0 %v1644_v0 }
 0x3a0   :  { %1269 = vmatpush3.bf16.msra.mxu0 %v1409_v56 }
 0x3a1   :  { %1270 = vmatprep.subr.bf16.mxu0 %v1644_v0 }
 0x3a4   :  { %1271 = vmatpush3.bf16.msra.mxu0 %v1410_v57 }
 0x3a5   :  { %1272 = vmatprep.subr.bf16.mxu0 %v1644_v0 }
 0x3a8   :  { %1273 = vmatpush3.bf16.msra.mxu0 %v1411_v58 }
 0x3a9   :  { %1274 = vmatprep.subr.bf16.mxu0 %v1644_v0 }
 0x3ac   :  { %1275 = vmatpush3.bf16.msra.mxu0 %v1412_v59 }
 0x3ad   :  { %1276 = vmatprep.subr.bf16.mxu0 %v1644_v0 }
 0x3b0   :  { %1277 = vmatpush3.bf16.msra.mxu0 %v1413_v60 }
 0x3b1   :  { %1278 = vmatprep.subr.bf16.mxu0 %v1644_v0  ;;  %v1194_v0 = vld [vmem:[%s1904_s14] ss:$0 sm:$0xff] }
 0x3b4   :  { %1279 = vmatpush3.bf16.msra.mxu0 %v1414_v61 }
 0x457   :  { %v1224_v1 = vpop.f32.mrf.mxu0 }
 0x459   :  { %v1225_v3 = vpop.f32.mrf.mxu0 }
 0x45a   :  { %v1226_v4 = vadd.f32 %v1225_v3, %v1224_v1 }
 0x45b   :  { %v1227_v5 = vpop.f32.mrf.mxu0 }
 0x45c   :  { %v889_v6 = vadd.f32 %v1226_v4, %v1168_v2 }
 0x45d   :  { %v1228_v7 = vpop.f32.mrf.mxu0 }
 0x45e   :  { %v911_v8 = vpack.c.bf16 %v889_v6, %v889_v6 }
 0x460   :  { %1281 = vmatmul.mubr.bf16.vlgmr.msra.gmra.mxu0 %v911_v8 }
 0x520   :  { %v1000_v12 = vpop.f32.mrf.mxu0 }
 0x521   :  { %v1001_v13 = vadd.f32 %v1185_v11, %v1000_v12 }
 0x522   :  { %v1282_v14 = vpop.f32.mrf.mxu0 }
 0x523   :  { %v1006_v15 = vmax.f32 %v1001_v13, 0.0 }
 0x524   :  { %v1003_v16 = vpop.f32.mrf.mxu0 }
 0x525   :  { %v1016_v17 = vpack.c.bf16 %v1006_v15, %v1006_v15 }
 0x526   :  { %v1283_v18 = vpop.f32.mrf.mxu0 }
 0x527   :  { %1293 = vmatmul.mubr.msk.bf16.vlgmr.msra.gmra.mxu1 %vm273_vm2, %v1016_v17 }
 0x5e7   :  { %v1084_v19 = vpop.f32.mrf.mxu1 }
 0x5e8   :  { %v1085_v20 = vadd.f32 %v1194_v0, %v1084_v19 }
 0x5e9   :  { %v1294_v21 = vpop.f32.mrf.mxu1 }
 0x5ea   :  { %1090 = vst.msk [vmem:[#allocation17] sm:$0xff] %vm189_vm1, %v1085_v20 }
 0x5eb   :  { %v1087_v22 = vpop.f32.mrf.mxu1 }
 0x5ec   :  { %1610 = shalt.err (!%p1607_p7)
}
 0x5ed   :  { %1100 = dma.vmem_to_hbm [thread:$0]  %s1098_s13, 128, %s1905_s15, [#allocation4]   ;;  %v1295_v23 = vpop.f32.mrf.mxu1 }
 0x5ee   :  { %1629 = dma.done.wait [#allocation4], 128  }
 0x5ef   :  { %1630 = vsyncadd [#allocation4], 4294967168 }
 0x5f0   :  { %1104 = vsyncpa [#allocation3], 1 }
 0x5f1   :  { %1105 = vsyncpa [#allocation6], 1 }
 0x5f2   :  { %1106 = vsyncpa [#allocation9], 1 }
 0x5f3   :  { %1107 = vsyncpa [#allocation12], 1 }
 0x5f4   :  { %1108 = vsyncpa [#allocation15], 1 }
 0x5f5   :  { %1109 = vsyncpa [#allocation4], 1 }

</bundles_post_ra>
